<compile_context>
chip_gen: v7x
topology: tpu7x:2x2x1
jax: 0.10.0
libtpu: 0.0.40
codegen_flags: <defaults>
</compile_context>

<pallas_src>
import numpy as np
import jax
import jax.numpy as jnp
from jax.experimental import pallas as pl
from jax.experimental.pallas import tpu as pltpu

_LANE = 128


def _cdiv(a: int, b: int) -> int:
    return -(-a // b)


def _round_up(a: int, b: int) -> int:
    return _cdiv(a, b) * b


def _sublane_granule(dtype) -> int:
    # sublane packing granule of the second-minor dim: f32 -> 8, bf16 -> 16, int8 -> 32
    return {4: 8, 2: 16, 1: 32}.get(np.dtype(dtype).itemsize, 8)


def _tpu_vmem_and_cores():
    """Physical per-core VMEM bytes, and whether this looks like a dual-TC chip (v7x)."""
    try:
        info = pltpu.get_tpu_info()
        vmem_phys = int(getattr(info, "vmem_capacity_bytes", 128 << 20))
    except Exception:
        vmem_phys = 128 << 20          # conservative fallback (v5e/v6e-like)
    two_cores = vmem_phys <= (64 << 20)  # v7x: 64 MiB VMEM per TC, 2 TCs per chip
    return vmem_phys, two_cores


def make_pe(d_model: int, max_len: int, dtype=jnp.float32):
    """Positional-encoding buffer, identical formula to the PyTorch __init__.

    Build it ONCE at model init in the compute dtype and reuse it every call
    (avoids a per-call slice+convert pass over pe).
    """
    position = np.arange(0, max_len, dtype=np.float32)[:, None]             # (L, 1)
    div_term = np.exp(np.arange(0, d_model, 2).astype(np.float32)
                      * (-np.log(10000.0) / d_model))                       # (D/2,)
    pe = np.zeros((max_len, d_model), dtype=np.float32)
    pe[:, 0::2] = np.sin(position * div_term)
    pe[:, 1::2] = np.cos(position * div_term)
    return jnp.asarray(pe, dtype=dtype)                                     # (L, D)


def pe_add_kernel(x_ref, pe_ref, o_ref):
    # x_ref/o_ref: (tile_s, B, tile_d); pe_ref: (tile_s, tile_d).
    # Broadcast pe over the batch (middle) axis; elementwise add on the VPU.
    o_ref[...] = x_ref[...] + pe_ref[...][:, None, :]


def positional_encoding(x: jax.Array, pe: jax.Array,
                        *, target_block_bytes: int | None = None) -> jax.Array:
    """x: (seq_len, batch, d_model); pe: (max_len, d_model). Returns x + pe[:S]."""
    S, B, D = x.shape
    assert pe.shape[1] == D and pe.shape[0] >= S
    if pe.dtype != x.dtype:
        # Fallback only: callers should cache pe in the compute dtype at init
        # (make_pe(..., dtype=compute_dtype)) so this extra XLA pass never runs.
        pe = pe.astype(x.dtype)

    itemsize = np.dtype(x.dtype).itemsize
    sublane = _sublane_granule(x.dtype)
    _, two_cores = _tpu_vmem_and_cores()

    # Scoped-VMEM request cap per generation (leave headroom for Mosaic scratch).
    vmem_cap = (32 << 20) if two_cores else (56 << 20)
    if target_block_bytes is None:
        # 6 double-buffered blocks (x, out, pe) + slack must fit under the cap.
        target_block_bytes = int(min(8 << 20, (vmem_cap - (2 << 20)) // 6))
    target_block_bytes = max(int(target_block_bytes), 1)

    # Padded footprint: Mosaic pads the batch dim to the sublane granule and the
    # lane dim to 128, so account with padded sizes (small B / bf16 matters).
    b_pad = _round_up(B, sublane)

    # --- optional D (lane-axis) tiling so blocks stay bounded for huge B*D.
    if D % _LANE == 0 and D > _LANE:
        cap_d = (target_block_bytes // max(sublane * b_pad * itemsize, 1)) // _LANE * _LANE
        tile_d = D if cap_d >= D else max(_LANE, cap_d)
    else:
        # TODO(synk): pad d_model to a multiple of 128 in the wrapper for fully
        # lane-dense (unmasked) stores when d_model % 128 != 0.
        tile_d = D
    d_pad = _round_up(tile_d, _LANE)

    # --- seq tile: as big as the per-block byte target allows, multiple of the
    # sublane granule (pe's second-minor dim), never more than S rounded up.
    row_bytes = b_pad * d_pad * itemsize
    rows = max(1, target_block_bytes // row_bytes)
    tile_s = max(sublane, (rows // sublane) * sublane)
    tile_s = min(tile_s, _round_up(S, sublane))

    # --- give every TensorCore at least 2 pipelined steps when S permits
    # (>= 4 total steps on dual-TC v7x, >= 3 on single-TC v5e/v6e).
    n_d = _cdiv(D, tile_d)
    min_steps = 4 if two_cores else 3
    if _cdiv(S, tile_s) * n_d < min_steps:
        want_s = _cdiv(min_steps, n_d)
        cand = max(sublane, _round_up(_cdiv(S, want_s), sublane))
        tile_s = min(tile_s, cand)
    n_s = _cdiv(S, tile_s)   # tail tile padded/masked by Pallas (elementwise-safe)

    # --- VMEM budget: double-buffered x + out + pe blocks (padded sizes) + slack.
    x_block = tile_s * b_pad * d_pad * itemsize
    pe_block = _round_up(tile_s, sublane) * d_pad * itemsize
    vmem_needed = 2 * (2 * x_block) + 2 * pe_block + (2 << 20)
    vmem_limit = int(min(vmem_cap, max(16 << 20, vmem_needed)))

    cost = pl.CostEstimate(
        flops=S * B * D,
        transcendentals=0,
        bytes_accessed=(2 * S * B * D + S * D) * itemsize,
    )

    return pl.pallas_call(
        pe_add_kernel,
        out_shape=jax.ShapeDtypeStruct((S, B, D), x.dtype),
        grid=(n_s, n_d),
        in_specs=[
            pl.BlockSpec((tile_s, B, tile_d), lambda i, j: (i, 0, j)),  # x seq/D tile
            # pe rows are bounded by the seq-grid index; no wrapper-side pe[:S] slice.
            pl.BlockSpec((tile_s, tile_d), lambda i, j: (i, j)),
        ],
        out_specs=pl.BlockSpec((tile_s, B, tile_d), lambda i, j: (i, 0, j)),
        compiler_params=pltpu.CompilerParams(
            dimension_semantics=("parallel", "parallel"),
            vmem_limit_bytes=vmem_limit,
        ),
        cost_estimate=cost,
        # TODO(synk): in a real model, fuse this add into an adjacent kernel
        # (embedding scale / dropout / first layernorm), or pass a donated x with
        # input_output_aliases={0: 0}; standalone, this op is capped at the HBM
        # roofline on every generation. If profiling shows a residual gap on v7x,
        # sweep pipeline_mode=pl.Buffered(3) on the x in_spec (budget permitting).
    )(x, pe)


if __name__ == "__main__":
    # Small shapes consistent with the module's forward: (seq, batch, d_model)
    SEQ, BATCH, D_MODEL, MAX_LEN = 8, 2, 32, 100

    key = jax.random.PRNGKey(0)
    x = jax.random.normal(key, (SEQ, BATCH, D_MODEL), dtype=jnp.float32)
    pe = make_pe(D_MODEL, MAX_LEN, dtype=x.dtype)   # cached once in the compute dtype

    out = jax.block_until_ready(positional_encoding(x, pe))
    ref = x + pe[:SEQ][:, None, :]
    np.testing.assert_allclose(np.asarray(out), np.asarray(ref), rtol=1e-6, atol=1e-6)

    # Also exercise the multi-tile pipelined path (grid > 1, partial tail tile)
    # at a still-small size by shrinking the per-block byte target.
    S2, B2, D2 = 20, 2, 32
    x2 = jax.random.normal(jax.random.PRNGKey(1), (S2, B2, D2), dtype=jnp.float32)
    out2 = jax.block_until_ready(
        positional_encoding(x2, pe, target_block_bytes=8 * B2 * D2 * 4))
    ref2 = x2 + pe[:S2][:, None, :]
    np.testing.assert_allclose(np.asarray(out2), np.asarray(ref2), rtol=1e-6, atol=1e-6)

    print("KERNEL_OK")
</pallas_src>

<mosaic_0001>
module attributes {stable_mosaic.version = 11 : i64} {
  func.func @pe_add_kernel(%arg0: i32, %arg1: i32, %arg2: memref<8x2x32xf32, #tpu.memory_space<vmem>>, %arg3: memref<8x32xf32, #tpu.memory_space<vmem>>, %arg4: memref<8x2x32xf32, #tpu.memory_space<vmem>>) attributes {dimension_semantics = [#tpu.dimension_semantics<parallel>, #tpu.dimension_semantics<parallel>], iteration_bounds = array<i64: 1, 1>, scalar_prefetch = 0 : i64, scratch_operands = 0 : i64, tpu.core_type = #tpu.core_type<tc>, window_params = [{transform_indices = @transform_0, window_bounds = array<i64: 8, 2, 32>}, {transform_indices = @transform_1, window_bounds = array<i64: 8, 32>}, {transform_indices = @transform_2, window_bounds = array<i64: 8, 2, 32>}]} {
    %c0 = arith.constant 0 : index
    %c0_0 = arith.constant 0 : index
    %c0_1 = arith.constant 0 : index
    %0 = vector.load %arg2[%c0, %c0_0, %c0_1] : memref<8x2x32xf32, #tpu.memory_space<vmem>>, vector<8x2x32xf32>
    %c0_2 = arith.constant 0 : index
    %c0_3 = arith.constant 0 : index
    %1 = vector.load %arg3[%c0_2, %c0_3] : memref<8x32xf32, #tpu.memory_space<vmem>>, vector<8x32xf32>
    %2 = vector.shape_cast %1 : vector<8x32xf32> to vector<8x1x32xf32>
    %3 = vector.broadcast %2 : vector<8x1x32xf32> to vector<8x2x32xf32>
    %4 = arith.addf %0, %3 : vector<8x2x32xf32>
    %c0_4 = arith.constant 0 : index
    %c0_5 = arith.constant 0 : index
    %c0_6 = arith.constant 0 : index
    %5 = vector.load %arg4[%c0_4, %c0_5, %c0_6] : memref<8x2x32xf32, #tpu.memory_space<vmem>>, vector<8x2x32xf32>
    tpu.vector_store %arg4[%c0_4, %c0_5, %c0_6], %4 {strides = array<i32>} : memref<8x2x32xf32, #tpu.memory_space<vmem>>, vector<8x2x32xf32>,
    return
  }
  func.func @transform_0(%arg0: i32, %arg1: i32) -> (i32, i32, i32) {
    %c0_i32 = arith.constant 0 : i32
    %c0_i32_0 = arith.constant 0 : i32
    return %arg0, %c0_i32, %arg1 : i32, i32, i32
  }
  func.func @transform_1(%arg0: i32, %arg1: i32) -> (i32, i32) {
    %c0_i32 = arith.constant 0 : i32
    return %arg0, %arg1 : i32, i32
  }
  func.func @transform_2(%arg0: i32, %arg1: i32) -> (i32, i32, i32) {
    %c0_i32 = arith.constant 0 : i32
    %c0_i32_0 = arith.constant 0 : i32
    return %arg0, %c0_i32, %arg1 : i32, i32, i32
  }
}

</mosaic_0001>

<bundles_post_ra>
// kernel: tpu_custom_call.1
= control target key start
LH: loop header
LB: loop body
LE: loop exit
PB: predicated region body
PF: predicated region fallthrough
CT: control target
= control target key end

     0   :  { %v26_v1 = vlaneseq  ;;  %v172_v2 = vmov 1966171168   ;;  %s238_s0 = inlined_call_operand.vmem [shape: f32[8,2,32], index: 0, kind: input, shape index: {}]   ;;  %s239_s1 = inlined_call_operand.vmem [shape: f32[100,32], index: 1, kind: input, shape index: {}]   ;;  %s240_s2 = inlined_call_operand.hbm [shape: f32[8,2,32], index: 2, kind: output, shape index: {}]  }
   0x1   :  { %v20_v0 = vld [vmem:[%s239_s1] sm:$0xff]  ;;  %v24_v3 = vunpack.c.l.s4 %v172_v2 }
   0x2   :  { %v27_v4 = vshrl.u32 %v26_v1, 7  ;;  %v22_v6 = vcombine.high %v20_v0, %v20_v0 }
   0x3   :  { %v25_v5 = vunpack.c.0.s8 %v24_v3 }
   0x4   :  { %7 = vsyncpa [#allocation3], 0  ;;  %v73_v9 = vsub.s32 0, %v27_v4  ;;  %v12_v15 = vld [vmem:[%s238_s0] sm:$0x3]  ;;  %vm119_vm0 = vcmask 254976  }
   0x5   :  { %v28_v7 = vsub.s32 %v25_v5, %v27_v4  ;;  %v16_v19 = vld [vmem:[%s238_s0 + $0x8] sm:$0x3]  ;;  %v13_v21 = vld [vmem:[%s238_s0 + $0x2] sm:$0x3]  ;;  %v14_v22 = vld [vmem:[%s238_s0 + $0x4] sm:$0x3] }
   0x6   :  { %v17_v29 = vld [vmem:[%s238_s0 + $0xa] sm:$0x3]  ;;  %v18_v30 = vld [vmem:[%s238_s0 + $0xc] sm:$0x3]  ;;  %v15_v31 = vld [vmem:[%s238_s0 + $0x6] sm:$0x3] }
   0x7   :  { %v29_v8 = vrot.slane %v20_v0, %v28_v7  ;;  %v36_v10 = vrot.slane %v22_v6, %v28_v7  ;;  %v19_v39 = vld [vmem:[%s238_s0 + $0xe] sm:$0x3]  ;;  %s173_s26 = smov [#allocation2]  }
   0x8   :  { %s133_s27 = sshll.u32 %s173_s26, 4  ;;  %s134_s27 = int_to_ptr.vmem [resolvable:$true] %s133_s27 }
   0x9   :  { %v45_v11 = vrot.slane %v29_v8, %v28_v7  ;;  %v37_v12 = vcombine.high %v29_v8, %v29_v8  ;;  %v52_v13 = vrot.slane %v36_v10, %v28_v7  ;;  %v38_v14 = vcombine.high %v36_v10, %v36_v10  ;;  %s148_s0 = scalar_lea.vmem %s134_s27, 256  ;;  %p153_p1 = scmp.lt.s32.totalorder %s134_s27, %s134_s27 }
   0xa   :  { %p149_p0 = scmp.ne.s32.totalorder %s134_s27, %s148_s0  ;;  %p154_p2 = scmp.lt.s32.totalorder %s148_s0, %s148_s0 }
   0xb   :  { %v74_v16 = vrot.slane %v45_v11, %v73_v9  ;;  %v59_v17 = vrot.slane %v37_v12, %v28_v7  ;;  %v67_v18 = vcombine.high %v45_v11, %v45_v11  ;;  %v90_v20 = vrot.slane %v52_v13, %v73_v9 }
   0xc   :  { %v66_v23 = vrot.slane %v38_v14, %v28_v7  ;;  %v68_v24 = vcombine.high %v52_v13, %v52_v13  ;;  %p155_p3 = por %p154_p2, %p153_p1 }
   0xd   :  { %v111_v25 = vadd.f32 %v74_v16, %v12_v15  ;;  %v78_v26 = vrot.slane %v59_v17, %v73_v9  ;;  %v82_v27 = vrot.slane %v67_v18, %v73_v9  ;;  %v69_v28 = vcombine.high %v59_v17, %v59_v17 }
   0xe   :  { %v115_v32 = vadd.f32 %v90_v20, %v16_v19  ;;  %v94_v33 = vrot.slane %v66_v23, %v73_v9  ;;  %v98_v34 = vrot.slane %v68_v24, %v73_v9  ;;  %v70_v35 = vcombine.high %v66_v23, %v66_v23  ;;  %p156_p4 = pnand %p155_p3, %p149_p0 }
   0xf   :  { %120 = vst.msk [vmem:[#allocation2] sm:$0x3] %vm119_vm0, %v111_v25  ;;  %v112_v36 = vadd.f32 %v78_v26, %v13_v21  ;;  %v113_v37 = vadd.f32 %v82_v27, %v14_v22  ;;  %v86_v38 = vrot.slane %v69_v28, %v73_v9 }
  0x10   :  { %124 = vst.msk [vmem:[#allocation2 + $0x8] sm:$0x3] %vm119_vm0, %v115_v32  ;;  %v116_v40 = vadd.f32 %v94_v33, %v17_v29  ;;  %v117_v41 = vadd.f32 %v98_v34, %v18_v30  ;;  %v102_v42 = vrot.slane %v70_v35, %v73_v9 }
  0x11   :  { %121 = vst.msk [vmem:[#allocation2 + $0x2] sm:$0x3] %vm119_vm0, %v112_v36  ;;  %122 = vst.msk [vmem:[#allocation2 + $0x4] sm:$0x3] %vm119_vm0, %v113_v37  ;;  %v114_v43 = vadd.f32 %v86_v38, %v15_v31 }
  0x12   :  { %125 = vst.msk [vmem:[#allocation2 + $0xa] sm:$0x3] %vm119_vm0, %v116_v40  ;;  %126 = vst.msk [vmem:[#allocation2 + $0xc] sm:$0x3] %vm119_vm0, %v117_v41  ;;  %v118_v44 = vadd.f32 %v102_v42, %v19_v39 }
  0x13   :  { %123 = vst.msk [vmem:[#allocation2 + $0x6] sm:$0x3] %vm119_vm0, %v114_v43 }
  0x14   :  { %127 = vst.msk [vmem:[#allocation2 + $0xe] sm:$0x3] %vm119_vm0, %v118_v44 }
  0x15   :  { %159 = shalt.err (!%p156_p4)
}
  0x16   :  { %s160_s30 = scalar_lea.hbm %s240_s2, 256 }
  0x17   :  { %p161_p5 = scmp.ne.s32.totalorder %s240_s2, %s160_s30  ;;  %p164_p6 = scmp.lt.u32.totalorder %s160_s30, %s240_s2 }
  0x19   :  { %p166_p7 = pnand %p164_p6, %p161_p5 }
  0x1b   :  { %169 = shalt.err (!%p166_p7)
}
  0x1c   :  { %s174_s7 = smov 32   ;;  %s175_s8 = smov 2  }
  0x1d   :  { %139 = dma.vmem_to_hbm [thread:$0]  %s134_s27, 256, %s240_s2, [#allocation3], %s174_s7, %s174_s7, %s175_s8  }
  0x1e   :  { %170 = dma.done.wait [#allocation3], 256  }
  0x1f   :  { %171 = vsyncadd [#allocation3], 4294967040 }
  0x20   :  { %143 = vsyncpa [#allocation3], 1 }

</bundles_post_ra>
